<compile_context>
chip_gen: v5e
topology: v5e:2x2
jax: 0.10.0
libtpu: 0.0.40
codegen_flags: <defaults>
</compile_context>

<pallas_src>
import functools
import math

import jax
import jax.numpy as jnp
from jax.experimental import pallas as pl
from jax.experimental.pallas import tpu as pltpu

_LANE = 128
_VMEM_LIMIT_BYTES = 32 * 1024 * 1024   # > v5e 16 MiB default, <= v7x 64 MiB physical
_VMEM_TILE_BUDGET = 24 * 1024 * 1024   # headroom under the scoped limit


def _round_up(v, m):
    return (v + m - 1) // m * m


def _pick_tiles(n, in_pad, out_pad, itemsize, residual,
                budget=_VMEM_TILE_BUDGET):
    """Largest 128-aligned (tn, tk) whose double-buffered tiles fit the VMEM budget."""

    def resident_bytes(tk, tn):
        b = 2 * n * tk * itemsize          # x K-slice (double-buffered)
        b += 2 * tk * tn * itemsize        # weight tile (double-buffered)
        b += n * tn * 4                    # f32 accumulator scratch (single)
        b += 2 * n * tn * itemsize         # output tile (double-buffered)
        if residual:
            b += 2 * n * tn * itemsize     # residual x tile (double-buffered)
        return b

    cands = (512, 256, 128)
    # Prefer a wide output tile (lane-dense stores are the biggest lever), then wide K.
    for tn in cands:
        if out_pad % tn:
            continue
        for tk in cands:
            if in_pad % tk:
                continue
            if resident_bytes(tk, tn) <= budget:
                return tn, tk
    return 128, 128


def _dense_kernel(x_ref, w_ref, gamma_ref, beta_ref, *rest,
                  residual, eps, mm_dtype):
    """Fused: tiled matmul (K-reduction) -> BatchNorm1d (batch stats) -> residual."""
    if residual:
        xres_ref, o_ref, acc_ref = rest
    else:
        o_ref, acc_ref = rest

    k = pl.program_id(1)

    @pl.when(k == 0)
    def _init():
        acc_ref[...] = jnp.zeros_like(acc_ref)

    # MXU matmul for this (K, N-strip) tile; accumulate in f32.
    acc_ref[...] += jnp.dot(
        x_ref[...].astype(mm_dtype),
        w_ref[...].astype(mm_dtype),
        preferred_element_type=jnp.float32,
    )

    @pl.when(k == pl.num_programs(1) - 1)
    def _finalize():
        y = acc_ref[...]
        inv_n = jnp.float32(1.0 / y.shape[0])
        # One-pass batch statistics (biased variance, matching BatchNorm1d training).
        s = jnp.sum(y, axis=0, keepdims=True)
        ss = jnp.sum(y * y, axis=0, keepdims=True)
        mean = s * inv_n
        var = ss * inv_n - mean * mean
        scale = jax.lax.rsqrt(var + eps) * gamma_ref[...]
        out = (y - mean) * scale + beta_ref[...]
        if residual:  # static (trace-time) decision: in_features == out_features
            out = out + xres_ref[...].astype(jnp.float32)
        o_ref[...] = out.astype(o_ref.dtype)


def dense_forward(x, weight, gamma, beta, *, eps=1e-5, matmul_dtype=None):
    """Pallas wrapper matching Dense.forward semantics (bias='bn', training mode).

    matmul_dtype: optional dtype for the MXU operands (e.g. jnp.bfloat16 on
    v6e/v7x for peak throughput); accumulation is always f32 and BN math is f32.
    """
    n, in_f = x.shape
    in_f2, out_f = weight.shape
    assert in_f == in_f2, "weight shape mismatch"
    residual = in_f == out_f
    mm_dtype = jnp.dtype(matmul_dtype) if matmul_dtype is not None else x.dtype

    # Pad feature dims to lane width (128).  Zero-padded K columns do not change
    # x @ w; padded output columns are sliced off below.
    in_pad = _round_up(in_f, _LANE)
    out_pad = _round_up(out_f, _LANE)

    xp = x if in_pad == in_f else jnp.pad(x, ((0, 0), (0, in_pad - in_f)))
    wp = weight
    if in_pad != in_f or out_pad != out_f:
        wp = jnp.pad(weight, ((0, in_pad - in_f), (0, out_pad - out_f)))
    gamma_p = jnp.pad(gamma.astype(jnp.float32), (0, out_pad - out_f),
                      constant_values=1.0).reshape(1, out_pad)
    beta_p = jnp.pad(beta.astype(jnp.float32),
                     (0, out_pad - out_f)).reshape(1, out_pad)

    tn, tk = _pick_tiles(n, in_pad, out_pad, xp.dtype.itemsize, residual)
    grid = (out_pad // tn, in_pad // tk)

    in_specs = [
        pl.BlockSpec((n, tk), lambda j, k: (0, k)),      # x, K-sliced
        pl.BlockSpec((tk, tn), lambda j, k: (k, j)),     # weight tile
        pl.BlockSpec((1, tn), lambda j, k: (0, j)),      # gamma
        pl.BlockSpec((1, tn), lambda j, k: (0, j)),      # beta
    ]
    args = [xp, wp, gamma_p, beta_p]
    if residual:
        # Residual uses the *output-feature* slice of x (in_pad == out_pad here).
        in_specs.append(pl.BlockSpec((n, tn), lambda j, k: (0, j)))
        args.append(xp)

    kernel = functools.partial(_dense_kernel, residual=residual, eps=eps,
                               mm_dtype=mm_dtype)

    out = pl.pallas_call(
        kernel,
        out_shape=jax.ShapeDtypeStruct((n, out_pad), x.dtype),
        grid_spec=pltpu.PrefetchScalarGridSpec(
            num_scalar_prefetch=0,
            grid=grid,
            in_specs=in_specs,
            out_specs=pl.BlockSpec((n, tn), lambda j, k: (0, j)),
            scratch_shapes=[pltpu.VMEM((n, tn), jnp.float32)],
        ),
        compiler_params=pltpu.CompilerParams(
            dimension_semantics=("parallel", "arbitrary"),
            vmem_limit_bytes=_VMEM_LIMIT_BYTES,
        ),
    )(*args)

    return out if out_pad == out_f else out[:, :out_f]


def _reference(x, weight, gamma, beta, eps=1e-5):
    """Pure-JAX reference mirroring the PyTorch forward (training-mode BN)."""
    y = x @ weight
    mean = jnp.mean(y, axis=0, keepdims=True)
    var = jnp.mean((y - mean) ** 2, axis=0, keepdims=True)
    out = (y - mean) / jnp.sqrt(var + eps) * gamma + beta
    if x.shape[1] == weight.shape[1]:
        out = out + x
    return out


if __name__ == "__main__":
    key = jax.random.PRNGKey(0)
    k_x, k_w1, k_w2 = jax.random.split(key, 3)

    # Case 1: in_features == out_features  -> residual path taken.
    N, IN_F, OUT_F = 8, 32, 32
    stdv = 1.0 / math.sqrt(OUT_F)
    x = jax.random.normal(k_x, (N, IN_F), dtype=jnp.float32)
    w = jax.random.uniform(k_w1, (IN_F, OUT_F), dtype=jnp.float32,
                           minval=-stdv, maxval=stdv)
    gamma = jnp.ones((OUT_F,), jnp.float32)   # BatchNorm1d weight init
    beta = jnp.zeros((OUT_F,), jnp.float32)   # BatchNorm1d bias init

    out = jax.block_until_ready(dense_forward(x, w, gamma, beta))
    ref = _reference(x, w, gamma, beta)
    assert out.shape == (N, OUT_F)
    assert jnp.allclose(out, ref, atol=1e-4, rtol=1e-4), "mismatch (residual case)"

    # Case 2: in_features != out_features  -> no residual.
    OUT_F2 = 16
    stdv2 = 1.0 / math.sqrt(OUT_F2)
    w2 = jax.random.uniform(k_w2, (IN_F, OUT_F2), dtype=jnp.float32,
                            minval=-stdv2, maxval=stdv2)
    gamma2 = jnp.ones((OUT_F2,), jnp.float32)
    beta2 = jnp.zeros((OUT_F2,), jnp.float32)

    out2 = jax.block_until_ready(dense_forward(x, w2, gamma2, beta2))
    ref2 = _reference(x, w2, gamma2, beta2)
    assert out2.shape == (N, OUT_F2)
    assert jnp.allclose(out2, ref2, atol=1e-4, rtol=1e-4), "mismatch (no-residual case)"

    # Case 3: bf16 MXU-operand path (v6e / v7x fast path), f32 accumulation + BN.
    out3 = jax.block_until_ready(
        dense_forward(x, w, gamma, beta, matmul_dtype=jnp.bfloat16))
    assert out3.shape == (N, OUT_F)
    assert bool(jnp.all(jnp.isfinite(out3)))
    assert jnp.allclose(out3, ref, atol=5e-2, rtol=5e-2), "mismatch (bf16 matmul case)"

    print("KERNEL_OK")
</pallas_src>

<mosaic_0001>
module attributes {stable_mosaic.version = 11 : i64} {
  func.func @_dense_kernel(%arg0: i32, %arg1: i32, %arg2: memref<8x128xf32, #tpu.memory_space<vmem>>, %arg3: memref<128x128xf32, #tpu.memory_space<vmem>>, %arg4: memref<1x128xf32, #tpu.memory_space<vmem>>, %arg5: memref<1x128xf32, #tpu.memory_space<vmem>>, %arg6: memref<8x128xf32, #tpu.memory_space<vmem>>, %arg7: memref<8x128xf32, #tpu.memory_space<vmem>>, %arg8: memref<8x128xf32, #tpu.memory_space<vmem>>) attributes {dimension_semantics = [#tpu.dimension_semantics<parallel>, #tpu.dimension_semantics<arbitrary>], iteration_bounds = array<i64: 1, 1>, scalar_prefetch = 0 : i64, scratch_operands = 1 : i64, tpu.core_type = #tpu.core_type<tc>, window_params = [{transform_indices = @transform_0, window_bounds = array<i64: 8, 128>}, {transform_indices = @transform_1, window_bounds = array<i64: 128, 128>}, {transform_indices = @transform_2, window_bounds = array<i64: 1, 128>}, {transform_indices = @transform_3, window_bounds = array<i64: 1, 128>}, {transform_indices = @transform_4, window_bounds = array<i64: 8, 128>}, {transform_indices = @transform_5, window_bounds = array<i64: 8, 128>}]} {
    %c0_i32 = arith.constant 0 : i32
    %0 = arith.cmpi eq, %arg1, %c0_i32 : i32
    %1 = arith.extui %0 : i1 to i32
    %c0_i32_0 = arith.constant 0 : i32
    %2 = arith.cmpi ne, %1, %c0_i32_0 : i32
    scf.if %2 {
      %cst_10 = arith.constant 0.000000e+00 : f32
      %12 = vector.broadcast %cst_10 : f32 to vector<8x128xf32>
      %c0_11 = arith.constant 0 : index
      %c0_12 = arith.constant 0 : index
      %13 = vector.load %arg8[%c0_11, %c0_12] : memref<8x128xf32, #tpu.memory_space<vmem>>, vector<8x128xf32>
      tpu.vector_store %arg8[%c0_11, %c0_12], %12 {strides = array<i32>} : memref<8x128xf32, #tpu.memory_space<vmem>>, vector<8x128xf32>,
    } else {
    }
    %c0 = arith.constant 0 : index
    %c0_1 = arith.constant 0 : index
    %3 = vector.load %arg8[%c0, %c0_1] : memref<8x128xf32, #tpu.memory_space<vmem>>, vector<8x128xf32>
    %c0_2 = arith.constant 0 : index
    %c0_3 = arith.constant 0 : index
    %4 = vector.load %arg2[%c0_2, %c0_3] : memref<8x128xf32, #tpu.memory_space<vmem>>, vector<8x128xf32>
    %c0_4 = arith.constant 0 : index
    %c0_5 = arith.constant 0 : index
    %5 = vector.load %arg3[%c0_4, %c0_5] : memref<128x128xf32, #tpu.memory_space<vmem>>, vector<128x128xf32>
    %cst = arith.constant dense<0.000000e+00> : vector<8x128xf32>
    %6 = tpu.matmul %4, %5, %cst {dimension_numbers = #tpu.dot_dimension_numbers<[1], [0], [0], [1], [0, 0, 1, 1], [], []>} : vector<8x128xf32>, vector<128x128xf32>, vector<8x128xf32> -> vector<8x128xf32>
    %7 = arith.addf %3, %6 : vector<8x128xf32>
    %c0_6 = arith.constant 0 : index
    %c0_7 = arith.constant 0 : index
    %8 = vector.load %arg8[%c0_6, %c0_7] : memref<8x128xf32, #tpu.memory_space<vmem>>, vector<8x128xf32>
    tpu.vector_store %arg8[%c0_6, %c0_7], %7 {strides = array<i32>} : memref<8x128xf32, #tpu.memory_space<vmem>>, vector<8x128xf32>,
    %c0_i32_8 = arith.constant 0 : i32
    %9 = arith.cmpi eq, %arg1, %c0_i32_8 : i32
    %10 = arith.extui %9 : i1 to i32
    %c0_i32_9 = arith.constant 0 : i32
    %11 = arith.cmpi ne, %10, %c0_i32_9 : i32
    scf.if %11 {
      %c0_10 = arith.constant 0 : index
      %c0_11 = arith.constant 0 : index
      %12 = vector.load %arg8[%c0_10, %c0_11] : memref<8x128xf32, #tpu.memory_space<vmem>>, vector<8x128xf32>
      %cst_12 = arith.constant dense<0.000000e+00> : vector<128xf32>
      %13 = vector.multi_reduction <add>, %12, %cst_12 [0] : vector<8x128xf32> to vector<128xf32>
      %14 = vector.shape_cast %13 : vector<128xf32> to vector<1x128xf32>
      %15 = arith.mulf %12, %12 : vector<8x128xf32>
      %cst_13 = arith.constant dense<0.000000e+00> : vector<128xf32>
      %16 = vector.multi_reduction <add>, %15, %cst_13 [0] : vector<8x128xf32> to vector<128xf32>
      %17 = vector.shape_cast %16 : vector<128xf32> to vector<1x128xf32>
      %cst_14 = arith.constant 1.250000e-01 : f32
      %18 = vector.broadcast %cst_14 : f32 to vector<1x128xf32>
      %19 = arith.mulf %14, %18 : vector<1x128xf32>
      %cst_15 = arith.constant 1.250000e-01 : f32
      %20 = vector.broadcast %cst_15 : f32 to vector<1x128xf32>
      %21 = arith.mulf %17, %20 : vector<1x128xf32>
      %22 = arith.mulf %19, %19 : vector<1x128xf32>
      %23 = arith.subf %21, %22 : vector<1x128xf32>
      %cst_16 = arith.constant 9.99999974E-6 : f32
      %24 = vector.broadcast %cst_16 : f32 to vector<1x128xf32>
      %25 = arith.addf %23, %24 : vector<1x128xf32>
      %26 = math.rsqrt %25 : vector<1x128xf32>
      %c0_17 = arith.constant 0 : index
      %c0_18 = arith.constant 0 : index
      %27 = vector.load %arg4[%c0_17, %c0_18] : memref<1x128xf32, #tpu.memory_space<vmem>>, vector<1x128xf32>
      %28 = arith.mulf %26, %27 : vector<1x128xf32>
      %29 = vector.broadcast %19 : vector<1x128xf32> to vector<8x128xf32>
      %30 = arith.subf %12, %29 : vector<8x128xf32>
      %31 = vector.broadcast %28 : vector<1x128xf32> to vector<8x128xf32>
      %32 = arith.mulf %30, %31 : vector<8x128xf32>
      %c0_19 = arith.constant 0 : index
      %c0_20 = arith.constant 0 : index
      %33 = vector.load %arg5[%c0_19, %c0_20] : memref<1x128xf32, #tpu.memory_space<vmem>>, vector<1x128xf32>
      %34 = vector.broadcast %33 : vector<1x128xf32> to vector<8x128xf32>
      %35 = arith.addf %32, %34 : vector<8x128xf32>
      %c0_21 = arith.constant 0 : index
      %c0_22 = arith.constant 0 : index
      %36 = vector.load %arg6[%c0_21, %c0_22] : memref<8x128xf32, #tpu.memory_space<vmem>>, vector<8x128xf32>
      %37 = arith.addf %35, %36 : vector<8x128xf32>
      %c0_23 = arith.constant 0 : index
      %c0_24 = arith.constant 0 : index
      %38 = vector.load %arg7[%c0_23, %c0_24] : memref<8x128xf32, #tpu.memory_space<vmem>>, vector<8x128xf32>
      tpu.vector_store %arg7[%c0_23, %c0_24], %37 {strides = array<i32>} : memref<8x128xf32, #tpu.memory_space<vmem>>, vector<8x128xf32>,
    } else {
    }
    return
  }
  func.func @transform_0(%arg0: i32, %arg1: i32) -> (i32, i32) {
    %c0_i32 = arith.constant 0 : i32
    %c0_i32_0 = arith.constant 0 : i32
    return %c0_i32, %arg1 : i32, i32
  }
  func.func @transform_1(%arg0: i32, %arg1: i32) -> (i32, i32) {
    %c0_i32 = arith.constant 0 : i32
    return %arg1, %arg0 : i32, i32
  }
  func.func @transform_2(%arg0: i32, %arg1: i32) -> (i32, i32) {
    %c0_i32 = arith.constant 0 : i32
    %c0_i32_0 = arith.constant 0 : i32
    return %c0_i32, %arg0 : i32, i32
  }
  func.func @transform_3(%arg0: i32, %arg1: i32) -> (i32, i32) {
    %c0_i32 = arith.constant 0 : i32
    %c0_i32_0 = arith.constant 0 : i32
    return %c0_i32, %arg0 : i32, i32
  }
  func.func @transform_4(%arg0: i32, %arg1: i32) -> (i32, i32) {
    %c0_i32 = arith.constant 0 : i32
    %c0_i32_0 = arith.constant 0 : i32
    return %c0_i32, %arg0 : i32, i32
  }
  func.func @transform_5(%arg0: i32, %arg1: i32) -> (i32, i32) {
    %c0_i32 = arith.constant 0 : i32
    %c0_i32_0 = arith.constant 0 : i32
    return %c0_i32, %arg0 : i32, i32
  }
}

</mosaic_0001>

<bundles_post_ra>
// kernel: tpu_custom_call.1
= control target key start
LH: loop header
LB: loop body
LE: loop exit
PB: predicated region body
PF: predicated region fallthrough
CT: control target
= control target key end

     0   :  { %10 = vsyncpa [#allocation4], 0  ;;  %s337_s0 = inlined_call_operand.hbm [shape: f32[8,128], index: 0, kind: input, shape index: {}]   ;;  %s338_s1 = inlined_call_operand.hbm [shape: f32[128,128], index: 1, kind: input, shape index: {}]   ;;  %s339_s2 = inlined_call_operand.vmem [shape: f32[1,128], index: 2, kind: input, shape index: {}]   ;;  %s340_s3 = inlined_call_operand.vmem [shape: f32[1,128], index: 3, kind: input, shape index: {}]   ;;  %s341_s4 = inlined_call_operand.hbm [shape: f32[8,128], index: 4, kind: input, shape index: {}]   ;;  %s342_s5 = inlined_call_operand.hbm [shape: f32[8,128], index: 5, kind: output, shape index: {}]  }
   0x1   :  { %11 = vsyncpa [#allocation7], 0  ;;  %s28_s20 = sshll.u32 %s338_s1, 4  ;;  %s29_s20 = int_to_ptr.hbm [resolvable:$true] %s28_s20 }
   0x2   :  { %12 = vsyncpa [#allocation5], 0  ;;  %s283_s21 = smov [#allocation6]   ;;  %s18_s25 = sshll.u32 %s337_s0, 4  ;;  %s19_s25 = int_to_ptr.hbm [resolvable:$true] %s18_s25 }
   0x3   :  { %s30_s22 = sshll.u32 %s283_s21, 4  ;;  %s284_s26 = smov 128   ;;  %s31_s22 = int_to_ptr.vmem [resolvable:$true] %s30_s22 }
   0x4   :  { %s285_s27 = smov 8   ;;  %s286_s28 = smov [#allocation3]  }
   0x5   :  { %36 = dma.hbm_to_vmem [thread:$0]  %s29_s20, 2048, %s31_s22, [#allocation7], %s284_s26, %s284_s26, %s285_s27  }
   0x6   :  { %s20_s29 = sshll.u32 %s286_s28, 4  ;;  %s46_s7 = sshll.u32 %s341_s4, 4  ;;  %s21_s29 = int_to_ptr.vmem [resolvable:$true] %s20_s29  ;;  %s47_s7 = int_to_ptr.hbm [resolvable:$true] %s46_s7 }
   0x7   :  { %23 = dma.hbm_to_vmem [thread:$0]  %s19_s25, 128, %s21_s29, [#allocation4]  }
   0x8   :  { %s287_s1 = smov [#allocation8]  }
   0x9   :  { %s48_s8 = sshll.u32 %s287_s1, 4  ;;  %s49_s8 = int_to_ptr.vmem [resolvable:$true] %s48_s8 }
   0xa   :  { %51 = dma.hbm_to_vmem [thread:$0]  %s47_s7, 128, %s49_s8, [#allocation7]  }
   0xb   :  { %277 = dma.done.wait [#allocation4], 128  }
   0xc   :  { %278 = vsyncadd [#allocation4], 4294967168 }
   0xd   :  { %279 = dma.done.wait [#allocation7], 2176  }
   0xe   :  { %280 = vsyncadd [#allocation7], 4294965120  ;;  %v86_v0 = vld [vmem:[#allocation6 + $0x78] sm:$0xff]  ;;  %v85_v1 = vld [vmem:[#allocation6 + $0x70] sm:$0xff]  ;;  %s288_s11 = smov [#allocation9]   ;;  %s161_s15 = sshll.u32 %s342_s5, 4  ;;  %s162_s15 = int_to_ptr.hbm [resolvable:$true] %s161_s15 }
   0xf   :  { %87 = vmatpush.msra.mxu0 %v86_v0  ;;  %v84_v2 = vld [vmem:[#allocation6 + $0x68] sm:$0xff]  ;;  %v83_v3 = vld [vmem:[#allocation6 + $0x60] sm:$0xff]  ;;  %v82_v4 = vld [vmem:[#allocation6 + $0x58] sm:$0xff]  ;;  %s159_s12 = sshll.u32 %s288_s11, 4  ;;  %s160_s12 = int_to_ptr.vmem [resolvable:$true] %s159_s12 }
  0x10   :  { %v81_v5 = vld [vmem:[#allocation6 + $0x50] sm:$0xff]  ;;  %v80_v6 = vld [vmem:[#allocation6 + $0x48] sm:$0xff]  ;;  %v79_v7 = vld [vmem:[#allocation6 + $0x40] sm:$0xff] }
  0x11   :  { %88 = vmatpush.msra.mxu0 %v85_v1  ;;  %v78_v8 = vld [vmem:[#allocation6 + $0x38] sm:$0xff]  ;;  %v77_v9 = vld [vmem:[#allocation6 + $0x30] sm:$0xff]  ;;  %v76_v10 = vld [vmem:[#allocation6 + $0x28] sm:$0xff] }
  0x12   :  { %v75_v11 = vld [vmem:[#allocation6 + $0x20] sm:$0xff]  ;;  %v74_v12 = vld [vmem:[#allocation6 + $0x18] sm:$0xff]  ;;  %v73_v13 = vld [vmem:[#allocation6 + $0x10] sm:$0xff] }
  0x13   :  { %89 = vmatpush.msra.mxu0 %v84_v2  ;;  %v72_v14 = vld [vmem:[#allocation6 + $0x8] sm:$0xff]  ;;  %v71_v15 = vld [vmem:[#allocation6] sm:$0xff]  ;;  %v70_v16 = vld [vmem:[#allocation3] sm:$0xff] }
  0x14   :  { %v141_v42 = vld [vmem:[%s339_s2] sm:$0x1]  ;;  %v151_v49 = vld [vmem:[#allocation8] sm:$0xff] }
  0x15   :  { %90 = vmatpush.msra.mxu0 %v83_v3  ;;  %v178_v47 = vld [vmem:[%s340_s3] ss:$0 sm:$0xff] }
  0x17   :  { %91 = vmatpush.msra.mxu0 %v82_v4 }
  0x19   :  { %92 = vmatpush.msra.mxu0 %v81_v5 }
  0x1b   :  { %93 = vmatpush.msra.mxu0 %v80_v6 }
  0x1d   :  { %94 = vmatpush.msra.mxu0 %v79_v7 }
  0x1f   :  { %95 = vmatpush.msra.mxu0 %v78_v8 }
  0x21   :  { %96 = vmatpush.msra.mxu0 %v77_v9 }
  0x23   :  { %97 = vmatpush.msra.mxu0 %v76_v10 }
  0x25   :  { %98 = vmatpush.msra.mxu0 %v75_v11 }
  0x27   :  { %99 = vmatpush.msra.mxu0 %v74_v12 }
  0x29   :  { %100 = vmatpush.msra.mxu0 %v73_v13 }
  0x2b   :  { %101 = vmatpush.msra.mxu0 %v72_v14 }
  0x2d   :  { %102 = vmatpush.msra.mxu0 %v71_v15 }
  0x2e   :  { %103 = vmatmul.f32.vlgmr.msra.gmra.mxu0 %v70_v16 }
  0xab   :  { %v104_v17 = vpop.f32.mrf.mxu0 }
  0xac   :  { %v113_v18 = vrot.slane %v104_v17, 4  ;;  %v119_v19 = vmul.f32 %v104_v17, %v104_v17 }
  0xae   :  { %v114_v20 = vadd.f32 %v113_v18, %v104_v17  ;;  %v120_v21 = vrot.slane %v119_v19, 4 }
  0xb0   :  { %v115_v22 = vrot.slane %v114_v20, 2  ;;  %v121_v23 = vadd.f32 %v120_v21, %v119_v19 }
  0xb2   :  { %v116_v24 = vadd.f32 %v115_v22, %v114_v20  ;;  %v122_v25 = vrot.slane %v121_v23, 2 }
  0xb4   :  { %v117_v26 = vrot.slane %v116_v24, 1  ;;  %v123_v27 = vadd.f32 %v122_v25, %v121_v23 }
  0xb6   :  { %v118_v28 = vadd.f32 %v117_v26, %v116_v24  ;;  %v124_v29 = vrot.slane %v123_v27, 1 }
  0xb8   :  { %v125_v30 = vadd.f32 %v124_v29, %v123_v27  ;;  %v126_v31 = vmul.f32 0.125, %v118_v28 }
  0xba   :  { %v127_v32 = vmul.f32 0.125, %v125_v30  ;;  %v128_v33 = vmul.f32 %v126_v31, %v126_v31  ;;  %v143_v45 = vsub.f32 %v104_v17, %v126_v31 }
  0xbc   :  { %v129_v34 = vsub.f32 %v127_v32, %v128_v33 }
  0xbe   :  { %v130_v35 = vadd.f32 1e-05, %v129_v34 }
  0xc0   :  { %179 = vrsqrt.f32 %v130_v35  ;;  %vm137_vm1 = vweird.f32 %v130_v35 }
  0xc6   :  { %v180_v36 = vpop.eup %179 }
  0xc7   :  { %v132_v37 = vmul.f32 %v180_v36, %v130_v35  ;;  %vm138_vm0 = vweird.f32 %v180_v36 }
  0xc8   :  { %vm139_vm2 = vmor %vm137_vm1, %vm138_vm0 }
  0xc9   :  { %v133_v38 = vmul.f32 %v180_v36, %v132_v37 }
  0xcb   :  { %v134_v39 = vmul.f32 0.5, %v133_v38 }
  0xcd   :  { %v135_v40 = vsub.f32 1.5, %v134_v39 }
  0xcf   :  { %v136_v41 = vmul.f32 %v180_v36, %v135_v40 }
  0xd1   :  { %v140_v43 = vsel %vm139_vm2, %v180_v36, %v136_v41 }
  0xd2   :  { %v142_v44 = vmul.f32 %v141_v42, %v140_v43 }
  0xd4   :  { %v144_v46 = vperm.slane %v142_v44, 0 }
  0xd6   :  { %v145_v48 = vmul.f32 %v144_v46, %v143_v45 }
  0xd8   :  { %v150_v50 = vadd.f32 %v178_v47, %v145_v48 }
  0xda   :  { %v152_v51 = vadd.f32 %v151_v49, %v150_v50 }
  0xdc   :  { %153 = vst [vmem:[#allocation9] sm:$0xff] %v152_v51 }
  0xdd   :  { %164 = dma.vmem_to_hbm [thread:$0]  %s160_s12, 128, %s162_s15, [#allocation5]  }
  0xde   :  { %281 = dma.done.wait [#allocation5], 128  }
  0xdf   :  { %282 = vsyncadd [#allocation5], 4294967168 }
  0xe0   :  { %169 = vsyncpa [#allocation4], 1 }
  0xe1   :  { %170 = vsyncpa [#allocation7], 1 }
  0xe2   :  { %171 = vsyncpa [#allocation5], 1 }

</bundles_post_ra>
